<compile_context>
chip_gen: v5e
topology: v5e:2x2
jax: 0.10.0
libtpu: 0.0.40
codegen_flags: <defaults>
</compile_context>

<pallas_src>
import functools

import jax
import jax.numpy as jnp
from jax.experimental import pallas as pl
from jax.experimental.pallas import tpu as pltpu


_VMEM_LIMIT = 32 * 1024 * 1024          # scoped VMEM budget (safe on v5e/v6e/v7x)
_BLOCK_BUDGET = _VMEM_LIMIT // 4        # 2x double-buffer * (in + out) per block
_SMALL_IMG_BYTES = 1 << 20              # batch-fold threshold (per-image slab)


# --------------------------------------------------------------------------
# Kernels
# --------------------------------------------------------------------------
def _spatial_ln_kernel(x_ref, g_ref, b_ref, o_ref, *, eps):
    """Block (C, T): reduce over C (sublanes), T spatial lanes independent."""
    xf = x_ref[...].astype(jnp.float32)                       # single block read
    mean = jnp.mean(xf, axis=0, keepdims=True)                 # (1, T)
    mean_sq = jnp.mean(xf * xf, axis=0, keepdims=True)         # (1, T)
    var = jnp.maximum(mean_sq - mean * mean, 0.0)              # unbiased=False
    inv = pl.reciprocal(jnp.sqrt(var) + eps, approx=False)     # EUP, per lane-row
    y = (xf - mean) * inv * g_ref[...] + b_ref[...]            # g/b: (C,1) bcast
    o_ref[...] = y.astype(o_ref.dtype)


def _batched_ln_kernel(x_ref, g_ref, b_ref, o_ref, *, eps):
    """Block (tb, C, HW): reduce over axis=1 (channels) only."""
    xf = x_ref[...].astype(jnp.float32)
    mean = jnp.mean(xf, axis=1, keepdims=True)                 # (tb, 1, HW)
    mean_sq = jnp.mean(xf * xf, axis=1, keepdims=True)
    var = jnp.maximum(mean_sq - mean * mean, 0.0)
    inv = pl.reciprocal(jnp.sqrt(var) + eps, approx=False)
    y = (xf - mean) * inv * g_ref[...] + b_ref[...]            # (C,1)->(1,C,1) bcast
    o_ref[...] = y.astype(o_ref.dtype)


# --------------------------------------------------------------------------
# Tiling helpers
# --------------------------------------------------------------------------
def _pick_spatial_tile(hw, c, itemsize):
    """Largest 128-multiple spatial tile fitting the per-block VMEM budget."""
    if hw <= 128:
        return hw                                    # full extent (always legal)
    max_by_vmem = _BLOCK_BUDGET // max(c * itemsize, 1)
    tile = min((hw // 128) * 128, (max_by_vmem // 128) * 128, 16384)
    return max(tile, 128)


def _pick_batch_tile(batch, per_img_bytes):
    tb = max(1, min(batch, _BLOCK_BUDGET // max(per_img_bytes, 1)))
    if batch >= 2 and tb >= batch:                   # keep >=2 grid steps (megacore)
        tb = pl.cdiv(batch, 2)
    return tb


# --------------------------------------------------------------------------
# Wrapper
# --------------------------------------------------------------------------
def channel_layernorm(x_nchw, g, b, eps=1e-5, small_hw_threshold_bytes=_SMALL_IMG_BYTES):
    """LayerNorm over the channel dim of an NCHW tensor (CvT LayerNorm)."""
    B, C, H, W = x_nchw.shape
    HW = H * W
    itemsize = jnp.dtype(x_nchw.dtype).itemsize
    x3 = x_nchw.reshape(B, C, HW)                    # contiguous view, no copy
    g2 = g.reshape(C, 1).astype(jnp.float32)
    b2 = b.reshape(C, 1).astype(jnp.float32)

    cost = pl.CostEstimate(
        flops=int(5 * B * C * HW),
        transcendentals=int(2 * B * HW),
        bytes_accessed=int(2 * B * C * HW * itemsize + 2 * C * 4),
    )

    per_img = C * HW * itemsize
    if per_img <= small_hw_threshold_bytes:
        # ---- batch-fold path: whole (C, HW) slabs, tb images per step ----
        tb = _pick_batch_tile(B, per_img)
        grid = (pl.cdiv(B, tb),)
        out = pl.pallas_call(
            functools.partial(_batched_ln_kernel, eps=eps),
            grid=grid,
            in_specs=[
                pl.BlockSpec((tb, C, HW), lambda i: (i, 0, 0)),
                pl.BlockSpec((C, 1), lambda i: (0, 0)),
                pl.BlockSpec((C, 1), lambda i: (0, 0)),
            ],
            out_specs=pl.BlockSpec((tb, C, HW), lambda i: (i, 0, 0)),
            out_shape=jax.ShapeDtypeStruct((B, C, HW), x_nchw.dtype),
            compiler_params=pltpu.CompilerParams(
                dimension_semantics=("parallel",),
                vmem_limit_bytes=_VMEM_LIMIT,
            ),
            cost_estimate=cost,
        )(x3, g2, b2)
    else:
        # ---- spatial-tile path: large lane-dense tiles, cdiv grid -------
        tile = _pick_spatial_tile(HW, C, itemsize)
        grid = (B, pl.cdiv(HW, tile))
        out = pl.pallas_call(
            functools.partial(_spatial_ln_kernel, eps=eps),
            grid=grid,
            in_specs=[
                pl.BlockSpec((None, C, tile), lambda i, j: (i, 0, j)),
                pl.BlockSpec((C, 1), lambda i, j: (0, 0)),
                pl.BlockSpec((C, 1), lambda i, j: (0, 0)),
            ],
            out_specs=pl.BlockSpec((None, C, tile), lambda i, j: (i, 0, j)),
            out_shape=jax.ShapeDtypeStruct((B, C, HW), x_nchw.dtype),
            compiler_params=pltpu.CompilerParams(
                dimension_semantics=("parallel", "parallel"),
                vmem_limit_bytes=_VMEM_LIMIT,
            ),
            cost_estimate=cost,
        )(x3, g2, b2)
    return out.reshape(B, C, H, W)


# --------------------------------------------------------------------------
# Reference + main
# --------------------------------------------------------------------------
def _ref_layernorm(x, g, b, eps):
    mean = jnp.mean(x, axis=1, keepdims=True)
    var = jnp.mean(jnp.square(x - mean), axis=1, keepdims=True)   # unbiased=False
    return (x - mean) / (jnp.sqrt(var) + eps) * g + b


if __name__ == "__main__":
    eps = 1e-5
    key = jax.random.PRNGKey(0)

    # --- test 1: small shape -> batch-fold path -------------------------
    B, C, H, W = 2, 32, 16, 16
    kx, kg, kb, kx2 = jax.random.split(key, 4)
    x = jax.random.normal(kx, (B, C, H, W), jnp.float32)
    g = 1.0 + 0.1 * jax.random.normal(kg, (1, C, 1, 1), jnp.float32)
    b = 0.1 * jax.random.normal(kb, (1, C, 1, 1), jnp.float32)

    y = channel_layernorm(x, g, b, eps=eps)
    jax.block_until_ready(y)
    ref = _ref_layernorm(x, g, b, eps)
    assert y.shape == (B, C, H, W), y.shape
    assert bool(jnp.all(jnp.isfinite(y)))
    err = float(jnp.max(jnp.abs(y - ref)))
    assert err < 1e-5, f"batch-fold path max abs err {err}"

    # --- test 2: force the spatial-tile path (cdiv grid, partial tail) --
    B2, C2, H2, W2 = 1, 16, 24, 24          # HW=576 -> tile 512 + masked tail 64
    x2 = jax.random.normal(kx2, (B2, C2, H2, W2), jnp.float32)
    g2 = jnp.ones((1, C2, 1, 1), jnp.float32)
    b2 = jnp.zeros((1, C2, 1, 1), jnp.float32)
    y2 = channel_layernorm(x2, g2, b2, eps=eps, small_hw_threshold_bytes=0)
    jax.block_until_ready(y2)
    ref2 = _ref_layernorm(x2, g2, b2, eps)
    err2 = float(jnp.max(jnp.abs(y2 - ref2)))
    assert err2 < 1e-5, f"spatial path max abs err {err2}"

    print("KERNEL_OK")
</pallas_src>

<mosaic_0001>
module attributes {stable_mosaic.version = 11 : i64} {
  func.func @_batched_ln_kernel(%arg0: i32, %arg1: memref<1x32x256xf32, #tpu.memory_space<vmem>>, %arg2: memref<32x1xf32, #tpu.memory_space<vmem>>, %arg3: memref<32x1xf32, #tpu.memory_space<vmem>>, %arg4: memref<1x32x256xf32, #tpu.memory_space<vmem>>) attributes {dimension_semantics = [#tpu.dimension_semantics<parallel>], iteration_bounds = array<i64: 2>, scalar_prefetch = 0 : i64, scratch_operands = 0 : i64, tpu.core_type = #tpu.core_type<tc>, window_params = [{transform_indices = @transform_0, window_bounds = array<i64: 1, 32, 256>}, {pipeline_mode = #tpu.pipeline_mode<synchronous>, transform_indices = @transform_1, window_bounds = array<i64: 32, 1>}, {pipeline_mode = #tpu.pipeline_mode<synchronous>, transform_indices = @transform_2, window_bounds = array<i64: 32, 1>}, {transform_indices = @transform_3, window_bounds = array<i64: 1, 32, 256>}]} {
    %c0 = arith.constant 0 : index
    %c0_0 = arith.constant 0 : index
    %c0_1 = arith.constant 0 : index
    %0 = vector.load %arg1[%c0, %c0_0, %c0_1] : memref<1x32x256xf32, #tpu.memory_space<vmem>>, vector<1x32x256xf32>
    %cst = arith.constant dense<0.000000e+00> : vector<1x256xf32>
    %1 = vector.multi_reduction <add>, %0, %cst [1] : vector<1x32x256xf32> to vector<1x256xf32>
    %2 = vector.shape_cast %1 : vector<1x256xf32> to vector<1x1x256xf32>
    %cst_2 = arith.constant 3.200000e+01 : f32
    %3 = vector.broadcast %cst_2 : f32 to vector<1x1x256xf32>
    %4 = arith.divf %2, %3 : vector<1x1x256xf32>
    %5 = arith.mulf %0, %0 : vector<1x32x256xf32>
    %cst_3 = arith.constant dense<0.000000e+00> : vector<1x256xf32>
    %6 = vector.multi_reduction <add>, %5, %cst_3 [1] : vector<1x32x256xf32> to vector<1x256xf32>
    %7 = vector.shape_cast %6 : vector<1x256xf32> to vector<1x1x256xf32>
    %cst_4 = arith.constant 3.200000e+01 : f32
    %8 = vector.broadcast %cst_4 : f32 to vector<1x1x256xf32>
    %9 = arith.divf %7, %8 : vector<1x1x256xf32>
    %10 = arith.mulf %4, %4 : vector<1x1x256xf32>
    %11 = arith.subf %9, %10 : vector<1x1x256xf32>
    %cst_5 = arith.constant 0.000000e+00 : f32
    %12 = vector.broadcast %cst_5 : f32 to vector<1x1x256xf32>
    %13 = arith.maximumf %11, %12 : vector<1x1x256xf32>
    %14 = math.sqrt %13 : vector<1x1x256xf32>
    %cst_6 = arith.constant 9.99999974E-6 : f32
    %15 = vector.broadcast %cst_6 : f32 to vector<1x1x256xf32>
    %16 = arith.addf %14, %15 : vector<1x1x256xf32>
    %17 = tpu.reciprocal %16 : vector<1x1x256xf32> -> vector<1x1x256xf32>
    %18 = vector.broadcast %4 : vector<1x1x256xf32> to vector<1x32x256xf32>
    %19 = arith.subf %0, %18 : vector<1x32x256xf32>
    %20 = vector.broadcast %17 : vector<1x1x256xf32> to vector<1x32x256xf32>
    %21 = arith.mulf %19, %20 : vector<1x32x256xf32>
    %c0_7 = arith.constant 0 : index
    %c0_8 = arith.constant 0 : index
    %22 = vector.load %arg2[%c0_7, %c0_8] : memref<32x1xf32, #tpu.memory_space<vmem>>, vector<32x1xf32>
    %23 = vector.shape_cast %22 : vector<32x1xf32> to vector<1x32x1xf32>
    %24 = vector.broadcast %23 : vector<1x32x1xf32> to vector<1x32x256xf32>
    %25 = arith.mulf %21, %24 : vector<1x32x256xf32>
    %c0_9 = arith.constant 0 : index
    %c0_10 = arith.constant 0 : index
    %26 = vector.load %arg3[%c0_9, %c0_10] : memref<32x1xf32, #tpu.memory_space<vmem>>, vector<32x1xf32>
    %27 = vector.shape_cast %26 : vector<32x1xf32> to vector<1x32x1xf32>
    %28 = vector.broadcast %27 : vector<1x32x1xf32> to vector<1x32x256xf32>
    %29 = arith.addf %25, %28 : vector<1x32x256xf32>
    %c0_11 = arith.constant 0 : index
    %c0_12 = arith.constant 0 : index
    %c0_13 = arith.constant 0 : index
    %30 = vector.load %arg4[%c0_11, %c0_12, %c0_13] : memref<1x32x256xf32, #tpu.memory_space<vmem>>, vector<1x32x256xf32>
    tpu.vector_store %arg4[%c0_11, %c0_12, %c0_13], %29 {strides = array<i32>} : memref<1x32x256xf32, #tpu.memory_space<vmem>>, vector<1x32x256xf32>,
    return
  }
  func.func @transform_0(%arg0: i32) -> (i32, i32, i32) {
    %c0_i32 = arith.constant 0 : i32
    %c0_i32_0 = arith.constant 0 : i32
    %c0_i32_1 = arith.constant 0 : i32
    return %arg0, %c0_i32, %c0_i32_0 : i32, i32, i32
  }
  func.func @transform_1(%arg0: i32) -> (i32, i32) {
    %c0_i32 = arith.constant 0 : i32
    %c0_i32_0 = arith.constant 0 : i32
    %c0_i32_1 = arith.constant 0 : i32
    return %c0_i32, %c0_i32_0 : i32, i32
  }
  func.func @transform_2(%arg0: i32) -> (i32, i32) {
    %c0_i32 = arith.constant 0 : i32
    %c0_i32_0 = arith.constant 0 : i32
    %c0_i32_1 = arith.constant 0 : i32
    return %c0_i32, %c0_i32_0 : i32, i32
  }
  func.func @transform_3(%arg0: i32) -> (i32, i32, i32) {
    %c0_i32 = arith.constant 0 : i32
    %c0_i32_0 = arith.constant 0 : i32
    %c0_i32_1 = arith.constant 0 : i32
    return %arg0, %c0_i32, %c0_i32_0 : i32, i32, i32
  }
}

</mosaic_0001>

<bundles_post_ra>
// kernel: tpu_custom_call.1
= control target key start
LH: loop header
LB: loop body
LE: loop exit
PB: predicated region body
PF: predicated region fallthrough
CT: control target
= control target key end

     0   :  { %8 = vsyncpa [#allocation3], 0  ;;  %s936_s0 = inlined_call_operand.hbm [shape: f32[2,32,256], index: 0, kind: input, shape index: {}]   ;;  %s937_s1 = inlined_call_operand.vmem [shape: f32[32,1], index: 1, kind: input, shape index: {}]   ;;  %s938_s2 = inlined_call_operand.vmem [shape: f32[32,1], index: 2, kind: input, shape index: {}]   ;;  %s939_s3 = inlined_call_operand.hbm [shape: f32[2,32,256], index: 3, kind: output, shape index: {}]  }
   0x1   :  { %10 = vsyncpa [#allocation3 + $0x1], 0 }
   0x2   :  { %11 = vsyncpa [#allocation4], 0 }
   0x3   :  { %13 = vsyncpa [#allocation4 + $0x1], 0  ;;  %s696_s12 = smov 0   ;;  %s698_s13 = smov 0  }
   0x4   :  { %s700_s14 = smov 0   ;;  %s702_s15 = smov 0  }
   0x5 LB: > { %s717_s16 = sadd.s32 4294967295, %s668_s15   ;;  %s491_s17 = sadd.s32 4294967294, %s668_s15   ;;  %s668_s15 = sphi %s702_s15, %s949_s15   ;;  %s664_s14 = sphi %s700_s14, %s948_s14   ;;  %s660_s13 = sphi %s698_s13, %s947_s13   ;;  %s656_s12 = sphi %s696_s12, %s946_s12  }
   0x6   : > { %s721_s18 = sadd.s32 1, %s668_s15   ;;  %s26_s19 = sadd.s32 1, %s664_s14 }
   0x7   : > { %s23_s20 = ssub.s32 %s668_s15, %s721_s18  ;;  %p33_p0 = scmp.ne.s32.totalorder %s664_s14, %s660_s13 }
   0x8   : > { %p24_p1 = scmp.eq.s32.totalorder %s23_s20, 0  ;;  %p34_p2 = scmp.eq.s32.totalorder %s668_s15, 0 }
   0x9   : > { %p39_p3 = scmp.ne.s32.totalorder %s660_s13, %s656_s12  ;;  %p40_p4 = scmp.eq.s32.totalorder %s717_s16, 0 }
   0xa   : > { %s733_s21 = scalar_select %p24_p1, %s664_s14, %s26_s19  }
   0xb   : > { %p735_p5 = por %p34_p2, %p33_p0  ;;  %p739_p6 = por %p40_p4, %p39_p3 }
   0xc   : > { %p105_p7 = scmp.eq.s32.totalorder %s717_s16, 1  ;;  %p111_p8 = scmp.eq.s32.totalorder %s491_s17, 1 }
   0xd   : > { %p519_p10 = scmp.lt.s32.totalorder %s668_s15, 2  ;;  %s137_s26 = sand.u32 1, %s664_s14  }
   0xe   : > { %p746_p11 = por %p105_p7, %p33_p0  ;;  %p750_p12 = por %p111_p8, %p39_p3 }
   0xf   : > { %s505_s27 = sshll.u32 %s668_s15, 6  ;;  %s494_s28 = sshll.u32 %s137_s26, 6 }
  0x10   : > { %s146_s4 = scalar_lea.hbm %s936_s0, %s505_s27  ;;  %s141_s6 = scalar_lea.vmem [#allocation2], %s494_s28 }
  0x11   : > { %s147_s5 = sshll.u32 %s146_s4, 4  ;;  %s149_s7 = sshll.u32 %s141_s6, 4  ;;  %s148_s5 = int_to_ptr.hbm [resolvable:$true] %s147_s5  ;;  %s150_s7 = int_to_ptr.vmem [resolvable:$true] %s149_s7 }
  0x12   : > { %p761_p13 = pnand %p519_p10, %p735_p5  ;;  %p497_p0 = scmp.ge.s32.totalorder %s668_s15, 1 }
  0x13   : > { %p157_p1 = scmp.lt.s32.totalorder %s668_s15, 3  ;;  %s138_s9 = scalar_lea.sflag [#allocation3], %s137_s26 }
  0x14   : > { %s572_s10 = sshra.s32 %s148_s5, 4  ;;  %p576_p3 = pneg %p761_p13  ;;  %s573_s10 = int_to_ptr.hbm [resolvable:$true] %s572_s10 }
  0x15   : > { %s574_s11 = scalar_lea.hbm %s573_s10, 64  ;;  %s579_s20 = scalar_lea.hbm %s936_s0, 128 }
  0x16   : > { %p575_p2 = scmp.ne.s32.totalorder %s573_s10, %s574_s11  ;;  %p580_p5 = scmp.lt.s32.totalorder %s573_s10, %s936_s0 }
  0x17   : > { %p581_p8 = scmp.lt.s32.totalorder %s579_s20, %s574_s11 }
  0x18   : > { %p577_p4 = pnand %p576_p3, %p575_p2 }
  0x19   : > { %p582_p10 = por %p581_p8, %p580_p5 }
  0x1a   : > { %p578_p7 = pneg %p577_p4 }
  0x1c   : > { %p583_p9 = pnand %p582_p10, %p578_p7 }
  0x1e   : > { %586 = shalt.err (!%p583_p9)
}
  0x1f   : > { %s670_s26 = smov 256   ;;  %s671_s28 = smov 16  }
  0x20   : > { %514 = dma.hbm_to_vmem [thread:$0]  (!%p761_p13), %s148_s5, 1024, %s150_s7, %s138_s9, %s670_s26, %s670_s26, %s671_s28  }
  0x21   : > { %p158_p2 = pnand %p497_p0, %p157_p1 }
  0x22   : > { %s782_s29 = sand.u32 (!%p158_p2), 1, %s660_s13  }
  0x23   : > { %161 = sbr.rel (%p158_p2) target bundleno = 183 (0xb7), region = 32  ;;  %s498_s30 = sshll.u32 (!%p158_p2), %s782_s29, 6 }
  0x24   : > { %s164_s4 = scalar_lea.sflag (!%p158_p2), [#allocation3], %s782_s29  ;;  %s788_s6 = scalar_lea.vmem (!%p158_p2), [#allocation2], %s498_s30 }
  0x28   : > { %647 = dma.done.wait (%p739_p6), %s164_s4, 1024  }
  0x29   : > { %649 = vsyncadd (%p739_p6), %s164_s4, 4294966272  ;;  %v672_v0 = vmov 0   ;;  %v332_v1 = vld [vmem:[%s937_s1 + $0x10] sm:$0xff]  ;;  %v330_v2 = vld [vmem:[%s937_s1] sm:$0xff]  ;;  %v673_v21 = vmov 32.0   ;;  %s403_s10 = scalar_lea.sflag [#allocation4], %s782_s29 }
  0x2a   : > { %560 = vset.pattern.permute.xlu1 %v672_v0  ;;  %559 = vset.pattern.permute.xlu0 %v672_v0  ;;  %v362_v3 = vld [vmem:[%s938_s2] sm:$0xff]  ;;  %v333_v4 = vld [vmem:[%s937_s1 + $0x18] sm:$0xff]  ;;  %v331_v5 = vld [vmem:[%s937_s1 + $0x8] sm:$0xff]  ;;  %562 = vrcp.f32 %v673_v21  ;;  %s622_s22 = scalar_lea.hbm %s939_s3, 128 }
  0x2b   : > { %561 = vset.pattern.permute.xlu2 %v672_v0  ;;  %346 = vperm.xlu1 %560, %v332_v1   ;;  %v363_v6 = vld [vmem:[%s938_s2 + $0x8] sm:$0xff]  ;;  %v365_v7 = vld [vmem:[%s938_s2 + $0x18] sm:$0xff]  ;;  %v364_v8 = vld [vmem:[%s938_s2 + $0x10] sm:$0xff] }
  0x2c   : > { %336 = vperm.xlu0 %559, %v330_v2   ;;  %368 = vperm.xlu2 %561, %v362_v3   ;;  %v819_v9 = vld [vmem:[%s788_s6] sm:$0xff]  ;;  %v822_v10 = vld [vmem:[%s788_s6 + $0x8] sm:$0xff]  ;;  %v825_v11 = vld [vmem:[%s788_s6 + $0x10] sm:$0xff] }
  0x2d   : > { %v828_v12 = vld [vmem:[%s788_s6 + $0x18] sm:$0xff]  ;;  %v199_v13 = vadd.f32 %v825_v11, %v819_v9  ;;  %v226_v14 = vmul.f32 %v819_v9, %v819_v9  ;;  %v227_v15 = vmul.f32 %v822_v10, %v822_v10  ;;  %v228_v16 = vmul.f32 %v825_v11, %v825_v11  ;;  %v839_v17 = vld [vmem:[%s788_s6 + $0x20] sm:$0xff]  ;;  %v842_v18 = vld [vmem:[%s788_s6 + $0x28] sm:$0xff] }
  0x2e   : > { %v208_v19 = vadd.f32 %v828_v12, %v822_v10  ;;  %v229_v20 = vmul.f32 %v828_v12, %v828_v12  ;;  %v230_v23 = vmul.f32 %v839_v17, %v839_v17  ;;  %v231_v24 = vmul.f32 %v842_v18, %v842_v18  ;;  %v854_v25 = vld [vmem:[%s788_s6 + $0x30] sm:$0xff]  ;;  %v857_v26 = vld [vmem:[%s788_s6 + $0x38] sm:$0xff]  ;;  %s884_s6 = scalar_lea.vmem [#allocation5], %s498_s30  ;;  %s506_s30 = sshll.u32 %s717_s16, 6 }
  0x2f   : > { %v200_v22 = vadd.f32 %v199_v13, %v839_v17  ;;  %v234_v28 = vadd.f32 %v228_v16, %v226_v14  ;;  %v232_v31 = vmul.f32 %v854_v25, %v854_v25  ;;  %v233_v32 = vmul.f32 %v857_v26, %v857_v26  ;;  %s414_s9 = scalar_lea.hbm %s939_s3, %s506_s30  ;;  %s415_s16 = sshll.u32 %s884_s6, 4  ;;  %s416_s16 = int_to_ptr.vmem [resolvable:$true] %s415_s16 }
  0x30   : > { %v209_v27 = vadd.f32 %v208_v19, %v842_v18  ;;  %v243_v29 = vadd.f32 %v229_v20, %v227_v15  ;;  %v563_v40 = vpop.eup %562  ;;  %s417_s23 = sshll.u32 %s414_s9, 4  ;;  %s418_s23 = int_to_ptr.hbm [resolvable:$true] %s417_s23 }
  0x31   : > { %v201_v30 = vadd.f32 %v200_v22, %v854_v25  ;;  %v235_v34 = vadd.f32 %v234_v28, %v230_v23  ;;  %v218_v42 = vmul.f32 32.0, %v563_v40  ;;  %vm222_vm0 = vweird.f32 %v563_v40  ;;  %s616_s11 = sshra.s32 %s418_s23, 4  ;;  %s617_s11 = int_to_ptr.hbm [resolvable:$true] %s616_s11 }
  0x32   : > { %v210_v33 = vadd.f32 %v209_v27, %v857_v26  ;;  %v244_v35 = vadd.f32 %v243_v29, %v231_v24  ;;  %s618_s17 = scalar_lea.hbm %s617_s11, 64  ;;  %p623_p0 = scmp.lt.s32.totalorder %s617_s11, %s939_s3 }
  0x33   : > { %351 = vperm.xlu1 %560, %v333_v4   ;;  %v202_v36 = vrot.slane %v201_v30, 4  ;;  %v236_v38 = vadd.f32 %v235_v34, %v232_v31  ;;  %v219_v47 = vsub.f32 1.0, %v218_v42  ;;  %p619_p6 = scmp.ne.s32.totalorder %s617_s11, %s618_s17  ;;  %p624_p1 = scmp.lt.s32.totalorder %s622_s22, %s618_s17 }
  0x34   : > { %341 = vperm.xlu0 %559, %v331_v5   ;;  %373 = vperm.xlu2 %561, %v363_v6   ;;  %v211_v37 = vrot.slane %v210_v33, 4  ;;  %v245_v39 = vadd.f32 %v244_v35, %v233_v32 }
  0x35   : > { %v203_v41 = vadd.f32 %v202_v36, %v201_v30  ;;  %v237_v44 = vrot.slane %v236_v38, 4  ;;  %v220_v52 = vmul.f32 %v563_v40, %v219_v47  ;;  %p620_p9 = pnand %p619_p6, %p746_p11  ;;  %p625_p3 = por %p624_p1, %p623_p0 }
  0x36   : > { %v212_v43 = vadd.f32 %v211_v37, %v210_v33  ;;  %v246_v45 = vrot.slane %v245_v39, 4 }
  0x37   : > { %v204_v46 = vrot.slane %v203_v41, 2  ;;  %v238_v49 = vadd.f32 %v237_v44, %v236_v38  ;;  %v221_v57 = vadd.f32 %v563_v40, %v220_v52  ;;  %p621_p13 = pneg %p620_p9 }
  0x38   : > { %v213_v48 = vrot.slane %v212_v43, 2  ;;  %v247_v50 = vadd.f32 %v246_v45, %v245_v39 }
  0x39   : > { %v205_v51 = vadd.f32 %v204_v46, %v203_v41  ;;  %v239_v54 = vrot.slane %v238_v49, 2  ;;  %v223_v62 = vsel %vm222_vm0, %v563_v40, %v221_v57  ;;  %p626_p4 = pnand %p625_p3, %p621_p13 }
  0x3a   : > { %v214_v53 = vadd.f32 %v213_v48, %v212_v43  ;;  %v248_v55 = vrot.slane %v247_v50, 2 }
  0x3b   : > { %383 = vperm.xlu1 %560, %v365_v7   ;;  %v206_v56 = vrot.slane %v205_v51, 1  ;;  %v240_v59 = vadd.f32 %v239_v54, %v238_v49 }
  0x3c   : > { %378 = vperm.xlu0 %559, %v364_v8   ;;  %v215_v58 = vrot.slane %v214_v53, 1  ;;  %v249_v60 = vadd.f32 %v248_v55, %v247_v50 }
  0x3d   : > { %v207_v61 = vadd.f32 %v206_v56, %v205_v51  ;;  %v241_v0 = vrot.slane %v240_v59, 1 }
  0x3e   : > { %v216_v63 = vadd.f32 %v215_v58, %v214_v53  ;;  %v250_v1 = vrot.slane %v249_v60, 1 }
  0x3f   : > { %v866_v2 = vmul.f32 %v223_v62, %v207_v61  ;;  %v242_v4 = vadd.f32 %v241_v0, %v240_v59 }
  0x40   : > { %v868_v3 = vmul.f32 %v223_v62, %v216_v63  ;;  %v251_v5 = vadd.f32 %v250_v1, %v249_v60 }
  0x41   : > { %v254_v6 = vmul.f32 %v866_v2, %v866_v2  ;;  %v252_v7 = vmul.f32 %v242_v4, %v223_v62 }
  0x42   : > { %v253_v8 = vmul.f32 %v251_v5, %v223_v62  ;;  %v255_v13 = vmul.f32 %v868_v3, %v868_v3  ;;  %v314_v62 = vsub.f32 %v819_v9, %v866_v2  ;;  %v315_v63 = vsub.f32 %v822_v10, %v868_v3 }
  0x43   : > { %v256_v14 = vsub.f32 %v252_v7, %v254_v6 }
  0x44   : > { %v257_v15 = vsub.f32 %v253_v8, %v255_v13 }
  0x45   : > { %v258_v16 = vmax.f32 %v256_v14, 0.0 }
  0x46   : > { %v259_v19 = vmax.f32 %v257_v15, 0.0  ;;  %v316_v15 = vsub.f32 %v825_v11, %v866_v2  ;;  %v320_v11 = vsub.f32 %v854_v25, %v866_v2 }
  0x47   : > { %564 = vrsqrt.f32 %v258_v16  ;;  %vm267_vm1 = vcmp.eq.f32.partialorder %v258_v16, inf  ;;  %v270_v36 = vand.u32 2147483648, %v258_v16  ;;  %vm269_vm3 = vcmp.eq.f32.partialorder %v258_v16, 0.0 }
  0x48   : > { %566 = vrsqrt.f32 %v259_v19  ;;  %vm279_vm2 = vcmp.eq.f32.partialorder %v259_v19, inf  ;;  %v282_v38 = vand.u32 2147483648, %v259_v19  ;;  %vm281_vm4 = vcmp.eq.f32.partialorder %v259_v19, 0.0 }
  0x4d   : > { %v565_v20 = vpop.eup %564 }
  0x4e   : > { %v567_v21 = vpop.eup %566  ;;  %v261_v22 = vmul.f32 %v565_v20, %v258_v16 }
  0x4f   : > { %v273_v23 = vmul.f32 %v567_v21, %v259_v19 }
  0x50   : > { %v262_v24 = vmul.f32 %v565_v20, %v261_v22  ;;  %v319_v22 = vsub.f32 %v842_v18, %v868_v3 }
  0x51   : > { %v274_v27 = vmul.f32 %v567_v21, %v273_v23 }
  0x52   : > { %v263_v28 = vmul.f32 0.5, %v262_v24 }
  0x53   : > { %v275_v29 = vmul.f32 0.5, %v274_v27 }
  0x54   : > { %v264_v30 = vsub.f32 1.5, %v263_v28 }
  0x55   : > { %v276_v31 = vsub.f32 1.5, %v275_v29 }
  0x56   : > { %v265_v32 = vmul.f32 %v565_v20, %v264_v30 }
  0x57   : > { %v277_v33 = vmul.f32 %v567_v21, %v276_v31  ;;  %v318_v21 = vsub.f32 %v839_v17, %v866_v2 }
  0x58   : > { %v266_v34 = vmul.f32 %v265_v32, %v258_v16 }
  0x59   : > { %v278_v35 = vmul.f32 %v277_v33, %v259_v19 }
  0x5a   : > { %v268_v37 = vsel %vm267_vm1, %v258_v16, %v266_v34  ;;  %v317_v16 = vsub.f32 %v828_v12, %v868_v3  ;;  %v321_v12 = vsub.f32 %v857_v26, %v868_v3 }
  0x5b   : > { %v280_v39 = vsel %vm279_vm2, %v259_v19, %v278_v35  ;;  %v271_v40 = vsel %vm269_vm3, %v270_v36, %v268_v37 }
  0x5c   : > { %v283_v41 = vsel %vm281_vm4, %v282_v38, %v280_v39  ;;  %v284_v42 = vadd.f32 1e-05, %v271_v40 }
  0x5d   : > { %v285_v43 = vadd.f32 1e-05, %v283_v41 }
  0x5e   : > { %568 = vrcp.f32 %v284_v42  ;;  %vm291_vm5 = vweird.f32 %v284_v42  ;;  %v297_v52 = vand.u32 2147483648, %v284_v42  ;;  %v295_v55 = vand.u32 2147483647, %v284_v42 }
  0x5f   : > { %570 = vrcp.f32 %v285_v43  ;;  %vm305_vm7 = vweird.f32 %v285_v43  ;;  %v311_v53 = vand.u32 2147483648, %v285_v43  ;;  %v309_v57 = vand.u32 2147483647, %v285_v43 }
  0x60   : > { %v298_v58 = vor.u32 1.1754944e-38, %v297_v52  ;;  %vm296_vm11 = vcmp.eq.f32.partialorder %v295_v55, 8.507059e+37 }
  0x61   : > { %v312_v59 = vor.u32 1.1754944e-38, %v311_v53  ;;  %vm310_vm12 = vcmp.eq.f32.partialorder %v309_v57, 8.507059e+37 }
  0x64   : > { %v569_v44 = vpop.eup %568 }
  0x65   : > { %v571_v45 = vpop.eup %570  ;;  %v287_v46 = vmul.f32 %v569_v44, %v284_v42  ;;  %vm292_vm6 = vweird.f32 %v569_v44 }
  0x66   : > { %v301_v47 = vmul.f32 %v571_v45, %v285_v43  ;;  %vm306_vm8 = vweird.f32 %v571_v45  ;;  %vm293_vm9 = vmor %vm291_vm5, %vm292_vm6 }
  0x67   : > { %v288_v48 = vsub.f32 1.0, %v287_v46  ;;  %vm307_vm10 = vmor %vm305_vm7, %vm306_vm8 }
  0x68   : > { %v302_v49 = vsub.f32 1.0, %v301_v47 }
  0x69   : > { %v289_v50 = vmul.f32 %v569_v44, %v288_v48 }
  0x6a   : > { %v303_v51 = vmul.f32 %v571_v45, %v302_v49 }
  0x6b   : > { %v290_v54 = vadd.f32 %v569_v44, %v289_v50 }
  0x6c   : > { %v304_v56 = vadd.f32 %v571_v45, %v303_v51 }
  0x6d   : > { %v294_v60 = vsel %vm293_vm9, %v569_v44, %v290_v54 }
  0x6e   : > { %v308_v61 = vsel %vm307_vm10, %v571_v45, %v304_v56  ;;  %v299_v0 = vsel %vm296_vm11, %v298_v58, %v294_v60 }
  0x6f   : > { %v313_v1 = vsel %vm310_vm12, %v312_v59, %v308_v61  ;;  %v322_v4 = vmul.f32 %v314_v62, %v299_v0  ;;  %v324_v10 = vmul.f32 %v316_v15, %v299_v0  ;;  %v326_v29 = vmul.f32 %v318_v21, %v299_v0 }
  0x70   : > { %v323_v5 = vmul.f32 %v315_v63, %v313_v1  ;;  %v325_v20 = vmul.f32 %v317_v16, %v313_v1  ;;  %v328_v17 = vmul.f32 %v320_v11, %v299_v0  ;;  %v329_v31 = vmul.f32 %v321_v12, %v313_v1 }
  0x71   : > { %v327_v25 = vmul.f32 %v319_v22, %v313_v1 }
  0x86   : > { %v369_v6 = vpop.permute.xlu2 %368 }
  0x8e   : > { %v374_v30 = vpop.permute.xlu2 %373 }
  0x9d   : > { %v347_v7 = vpop.permute.xlu1 %346 }
  0x9e   : > { %v337_v8 = vpop.permute.xlu0 %336  ;;  %v358_v18 = vmul.f32 %v347_v7, %v326_v29  ;;  %v359_v3 = vmul.f32 %v347_v7, %v327_v25 }
  0x9f   : > { %v354_v13 = vmul.f32 %v337_v8, %v322_v4  ;;  %v355_v14 = vmul.f32 %v337_v8, %v323_v5 }
  0xa1   : > { %v386_v19 = vadd.f32 %v369_v6, %v354_v13  ;;  %v387_v9 = vadd.f32 %v369_v6, %v355_v14 }
  0xa3   : > { %394 = vst [vmem:[%s884_s6] sm:$0xff] %v386_v19 }
  0xa4   : > { %395 = vst [vmem:[%s884_s6 + $0x8] sm:$0xff] %v387_v9 }
  0xa5   : > { %v352_v23 = vpop.permute.xlu1 %351 }
  0xa6   : > { %v342_v24 = vpop.permute.xlu0 %341  ;;  %v360_v26 = vmul.f32 %v352_v23, %v328_v17  ;;  %v361_v2 = vmul.f32 %v352_v23, %v329_v31 }
  0xa7   : > { %v356_v27 = vmul.f32 %v342_v24, %v324_v10  ;;  %v357_v28 = vmul.f32 %v342_v24, %v325_v20 }
  0xa9   : > { %v388_v32 = vadd.f32 %v374_v30, %v356_v27  ;;  %v389_v33 = vadd.f32 %v374_v30, %v357_v28 }
  0xab   : > { %396 = vst [vmem:[%s884_s6 + $0x10] sm:$0xff] %v388_v32 }
  0xac   : > { %397 = vst [vmem:[%s884_s6 + $0x18] sm:$0xff] %v389_v33 }
  0xad   : > { %v384_v34 = vpop.permute.xlu1 %383 }
  0xae   : > { %v379_v35 = vpop.permute.xlu0 %378  ;;  %v392_v36 = vadd.f32 %v384_v34, %v360_v26  ;;  %v393_v37 = vadd.f32 %v384_v34, %v361_v2 }
  0xaf   : > { %v390_v38 = vadd.f32 %v379_v35, %v358_v18  ;;  %v391_v39 = vadd.f32 %v379_v35, %v359_v3 }
  0xb0   : > { %400 = vst [vmem:[%s884_s6 + $0x30] sm:$0xff] %v392_v36 }
  0xb1   : > { %401 = vst [vmem:[%s884_s6 + $0x38] sm:$0xff] %v393_v37 }
  0xb2   : > { %398 = vst [vmem:[%s884_s6 + $0x20] sm:$0xff] %v390_v38 }
  0xb3   : > { %399 = vst [vmem:[%s884_s6 + $0x28] sm:$0xff] %v391_v39 }
  0xb4   : > { %629 = shalt.err (!%p626_p4)
}
  0xb5   : > { %s674_s29 = smov 256   ;;  %s675_s28 = smov 16  }
  0xb6   : > { %509 = dma.vmem_to_hbm [thread:$0]  (%p746_p11), %s416_s16, 1024, %s418_s23, %s403_s10, %s674_s29, %s674_s29, %s675_s28  }
  0xb7 PF: > { %s432_s4 = sand.u32 1, %s656_s12   ;;  %p945_p7 = scmp.ge.s32.totalorder %s668_s15, 2 }
  0xb8   : > { %s433_s5 = scalar_lea.sflag [#allocation4], %s432_s4 }
  0xb9   : > { %p516_p5 = pnand %p945_p7, %p750_p12 }
  0xbb   : > { %p517_p8 = pneg %p516_p5 }
  0xbd   : > { %651 = dma.done.wait (%p517_p8), %s433_s5, 1024  }
  0xbe   : > { %653 = vsyncadd (%p517_p8), %s433_s5, 4294966272  ;;  %p16_p10 = scmp.ge.s32.totalorder %s721_s18, 4   ;;  %s946_s12 = smov %s660_s13 }
  0xbf   : > { %s947_s13 = smov %s664_s14  ;;  %s948_s14 = smov %s733_s21 }
  0xc0   : > { %s949_s15 = smov %s721_s18  ;;  %18 = sbr.rel (!%p16_p10) target bundleno = 5 (0x5), region = 77 }
  0xc5   :  { %439 = vsyncpa [#allocation3], 1 }
  0xc6   :  { %441 = vsyncpa [#allocation3 + $0x1], 1 }
  0xc7   :  { %442 = vsyncpa [#allocation4], 1 }
  0xc8   :  { %444 = vsyncpa [#allocation4 + $0x1], 1 }

</bundles_post_ra>
